<compile_context>
chip_gen: v6e
topology: v6e:2x2x1
jax: 0.10.0
libtpu: 0.0.40
codegen_flags: <defaults>
</compile_context>

<pallas_src>
import jax
import jax.numpy as jnp
from jax import lax
from jax.experimental import pallas as pl
from jax.experimental.pallas import tpu as pltpu

# ---- static module configuration (forward implies 11x11 input -> 7x7 after two VALID 3x3 convs)
IN_CH = 8                  # in_channels (must be divisible by 4)
OUT_CH = 10                # out_channels
G = IN_CH // 2             # conv1: groups == out_channels == in_channels // 2
C2 = IN_CH // 4            # conv2 out channels
H = W = 11                 # input spatial
H1 = H - 2                 # 9  (after conv1, VALID 3x3)
H2 = H1 - 2                # 7  (after conv2, VALID 3x3)
FLAT = C2 * H2 * H2        # 7*7*in_channels//4 == 98
K = IN_CH * H * W          # 968 == flattened-input contraction dim

_DN = ('NCHW', 'OIHW', 'NCHW')


def gemm_kernel(x_ref, w_ref, b_ref, o_ref):
    """One batch tile of the fully folded affine block.

    x_ref : (BT, K)        VMEM   flattened input rows (batch on sublanes)
    w_ref : (K, OUT_CH)    VMEM   folded conv+FC weight (grid-resident)
    b_ref : (1, OUT_CH)    VMEM   folded bias (grid-resident)
    o_ref : (BT, OUT_CH)   VMEM
    """
    o_ref[...] = (
        jnp.dot(x_ref[...], w_ref[...], preferred_element_type=jnp.float32)
        + b_ref[...]
    ).astype(o_ref.dtype)


def _fold_params(params):
    """Collapse conv1 -> conv2 -> FC1 -> FC2 -> FC3 (all linear, no activations)
    into a single (K, OUT_CH) weight and (1, OUT_CH) bias."""
    (w1, b1, w2, b2, fc1_w, fc1_b, fc2_w, fc2_b, fc3_w, fc3_b) = params

    # Effective conv map: run the bias-free conv chain on the K basis vectors.
    eye = jnp.eye(K, dtype=jnp.float32).reshape(K, IN_CH, H, W)
    y = lax.conv_general_dilated(eye, w1, (1, 1), 'VALID',
                                 dimension_numbers=_DN, feature_group_count=G)
    y = lax.conv_general_dilated(y, w2, (1, 1), 'VALID', dimension_numbers=_DN)
    w_conv = y.reshape(K, FLAT)                                  # (968, 98)

    # Conv bias contribution = conv chain applied to the zero input.
    z = jnp.zeros((1, IN_CH, H, W), jnp.float32)
    yb = lax.conv_general_dilated(z, w1, (1, 1), 'VALID',
                                  dimension_numbers=_DN, feature_group_count=G)
    yb = yb + b1[None, :, None, None]
    yb = lax.conv_general_dilated(yb, w2, (1, 1), 'VALID', dimension_numbers=_DN)
    yb = yb + b2[None, :, None, None]
    b_conv = yb.reshape(1, FLAT)                                 # (1, 98)

    # Activation-free FC chain fold.
    wc = fc1_w @ fc2_w @ fc3_w                                   # (98, 10)
    bc = (fc1_b @ fc2_w + fc2_b) @ fc3_w + fc3_b                 # (1, 10)

    w_total = w_conv @ wc                                        # (968, 10)
    b_total = b_conv @ wc + bc                                   # (1, 10)
    return w_total, b_total


def _choose_tiling(B):
    """Return (batch_tile, padded_batch).  Tiles are either the full batch or a
    multiple of 8 (sublane rule); padding is only used when a large batch does
    not divide any standard tile size."""
    if B <= 1024:
        # Split in two equal, 8-aligned tiles when possible so v7x's second
        # TensorCore has work; otherwise one tile covering the whole batch.
        if B >= 256 and B % 16 == 0:
            return B // 2, B
        return B, B
    for bt in (2048, 1024, 512, 256, 128):
        if B % bt == 0:
            return bt, B
    bt = 1024
    return bt, -(-B // bt) * bt


def task_block_forward(x, params):
    B = x.shape[0]
    w_total, b_total = _fold_params(params)

    # Free, contiguous flatten -- no transpose, no HBM round trip.
    x_flat = x.reshape(B, K).astype(jnp.float32)

    b_tile, Bp = _choose_tiling(B)
    if Bp != B:
        x_flat = jnp.pad(x_flat, ((0, Bp - B), (0, 0)))
    num_tiles = Bp // b_tile

    out = pl.pallas_call(
        gemm_kernel,
        grid=(num_tiles,),
        in_specs=[
            pl.BlockSpec((b_tile, K), lambda t: (t, 0)),          # batch tile
            pl.BlockSpec((K, OUT_CH), lambda t: (0, 0)),          # resident weight
            pl.BlockSpec((1, OUT_CH), lambda t: (0, 0)),          # resident bias
        ],
        out_specs=pl.BlockSpec((b_tile, OUT_CH), lambda t: (t, 0)),
        out_shape=jax.ShapeDtypeStruct((Bp, OUT_CH), jnp.float32),
        compiler_params=pltpu.CompilerParams(
            dimension_semantics=("parallel",)),
    )(x_flat, w_total, b_total)

    return out[:B]


def reference(x, params):
    """Pure-JAX reference matching the PyTorch forward (unfolded)."""
    (w1, b1, w2, b2, fc1_w, fc1_b, fc2_w, fc2_b, fc3_w, fc3_b) = params
    y = lax.conv_general_dilated(x, w1, (1, 1), 'VALID',
                                 dimension_numbers=_DN, feature_group_count=G)
    y = y + b1[None, :, None, None]
    y = lax.conv_general_dilated(y, w2, (1, 1), 'VALID', dimension_numbers=_DN)
    y = y + b2[None, :, None, None]
    y = y.reshape(y.shape[0], -1)
    y = y @ fc1_w + fc1_b
    y = y @ fc2_w + fc2_b
    y = y @ fc3_w + fc3_b
    return y


if __name__ == "__main__":
    key = jax.random.PRNGKey(0)
    ks = jax.random.split(key, 11)
    B = 2

    x = jax.random.normal(ks[0], (B, IN_CH, H, W), jnp.float32)

    # deterministic synthetic parameters (same shapes as the PyTorch module)
    w1 = 0.2 * jax.random.normal(ks[1], (G, 2, 3, 3), jnp.float32)      # conv1 (O, I/groups, kH, kW)
    b1 = 0.1 * jax.random.normal(ks[2], (G,), jnp.float32)
    w2 = 0.2 * jax.random.normal(ks[3], (C2, G, 3, 3), jnp.float32)     # conv2
    b2 = 0.1 * jax.random.normal(ks[4], (C2,), jnp.float32)
    fc1_w = 0.1 * jax.random.normal(ks[5], (FLAT, 64), jnp.float32)     # stored (in, out) == torch weight.T
    fc1_b = 0.1 * jax.random.normal(ks[6], (1, 64), jnp.float32)
    fc2_w = 0.1 * jax.random.normal(ks[7], (64, 32), jnp.float32)
    fc2_b = 0.1 * jax.random.normal(ks[8], (1, 32), jnp.float32)
    fc3_w = 0.1 * jax.random.normal(ks[9], (32, OUT_CH), jnp.float32)
    fc3_b = 0.1 * jax.random.normal(ks[10], (1, OUT_CH), jnp.float32)

    params = (w1, b1, w2, b2, fc1_w, fc1_b, fc2_w, fc2_b, fc3_w, fc3_b)

    fwd = jax.jit(task_block_forward)

    # small-batch check (single tile)
    out = jax.block_until_ready(fwd(x, params))
    ref = reference(x, params)
    assert out.shape == (B, OUT_CH), out.shape
    if not jnp.allclose(out, ref, atol=1e-4, rtol=1e-4):
        raise AssertionError("Pallas output does not match pure-JAX reference (B=2)")

    # multi-tile check (two 160-row tiles; exercises resident-weight / parallel grid)
    B2 = 320
    x2 = jax.random.normal(jax.random.PRNGKey(1), (B2, IN_CH, H, W), jnp.float32)
    out2 = jax.block_until_ready(fwd(x2, params))
    ref2 = reference(x2, params)
    assert out2.shape == (B2, OUT_CH), out2.shape
    if not jnp.allclose(out2, ref2, atol=1e-4, rtol=1e-4):
        raise AssertionError("Pallas output does not match pure-JAX reference (B=320)")

    print("KERNEL_OK")
</pallas_src>

<mosaic_0001>
module attributes {stable_mosaic.version = 11 : i64} {
  func.func @gemm_kernel(%arg0: i32, %arg1: memref<2x968xf32, #tpu.memory_space<vmem>>, %arg2: memref<968x10xf32, #tpu.memory_space<vmem>>, %arg3: memref<1x10xf32, #tpu.memory_space<vmem>>, %arg4: memref<2x10xf32, #tpu.memory_space<vmem>>) attributes {dimension_semantics = [#tpu.dimension_semantics<parallel>], iteration_bounds = array<i64: 1>, scalar_prefetch = 0 : i64, scratch_operands = 0 : i64, tpu.core_type = #tpu.core_type<tc>, window_params = [{transform_indices = @transform_0, window_bounds = array<i64: 2, 968>}, {pipeline_mode = #tpu.pipeline_mode<synchronous>, transform_indices = @transform_1, window_bounds = array<i64: 968, 10>}, {pipeline_mode = #tpu.pipeline_mode<synchronous>, transform_indices = @transform_2, window_bounds = array<i64: 1, 10>}, {transform_indices = @transform_3, window_bounds = array<i64: 2, 10>}]} {
    %c0 = arith.constant 0 : index
    %c0_0 = arith.constant 0 : index
    %0 = vector.load %arg1[%c0, %c0_0] : memref<2x968xf32, #tpu.memory_space<vmem>>, vector<2x968xf32>
    %c0_1 = arith.constant 0 : index
    %c0_2 = arith.constant 0 : index
    %1 = vector.load %arg2[%c0_1, %c0_2] : memref<968x10xf32, #tpu.memory_space<vmem>>, vector<968x10xf32>
    %cst = arith.constant dense<0.000000e+00> : vector<2x10xf32>
    %2 = tpu.matmul %0, %1, %cst {dimension_numbers = #tpu.dot_dimension_numbers<[1], [0], [0], [1], [0, 0, 1, 1], [], []>} : vector<2x968xf32>, vector<968x10xf32>, vector<2x10xf32> -> vector<2x10xf32>
    %c0_3 = arith.constant 0 : index
    %c0_4 = arith.constant 0 : index
    %3 = vector.load %arg3[%c0_3, %c0_4] : memref<1x10xf32, #tpu.memory_space<vmem>>, vector<1x10xf32>
    %4 = vector.broadcast %3 : vector<1x10xf32> to vector<2x10xf32>
    %5 = arith.addf %2, %4 : vector<2x10xf32>
    %c0_5 = arith.constant 0 : index
    %c0_6 = arith.constant 0 : index
    %6 = vector.load %arg4[%c0_5, %c0_6] : memref<2x10xf32, #tpu.memory_space<vmem>>, vector<2x10xf32>
    tpu.vector_store %arg4[%c0_5, %c0_6], %5 {strides = array<i32>} : memref<2x10xf32, #tpu.memory_space<vmem>>, vector<2x10xf32>,
    return
  }
  func.func @transform_0(%arg0: i32) -> (i32, i32) {
    %c0_i32 = arith.constant 0 : i32
    %c0_i32_0 = arith.constant 0 : i32
    return %arg0, %c0_i32 : i32, i32
  }
  func.func @transform_1(%arg0: i32) -> (i32, i32) {
    %c0_i32 = arith.constant 0 : i32
    %c0_i32_0 = arith.constant 0 : i32
    %c0_i32_1 = arith.constant 0 : i32
    return %c0_i32, %c0_i32_0 : i32, i32
  }
  func.func @transform_2(%arg0: i32) -> (i32, i32) {
    %c0_i32 = arith.constant 0 : i32
    %c0_i32_0 = arith.constant 0 : i32
    %c0_i32_1 = arith.constant 0 : i32
    return %c0_i32, %c0_i32_0 : i32, i32
  }
  func.func @transform_3(%arg0: i32) -> (i32, i32) {
    %c0_i32 = arith.constant 0 : i32
    %c0_i32_0 = arith.constant 0 : i32
    return %arg0, %c0_i32 : i32, i32
  }
}

</mosaic_0001>

<bundles_post_ra>
// kernel: task_block_forward.1
= control target key start
LH: loop header
LB: loop body
LE: loop exit
PB: predicated region body
PF: predicated region fallthrough
CT: control target
= control target key end

     0   :  { %v621_v30 = vmov 1983009808   ;;  %v151_v32 = vlaneseq  ;;  %s1050_s0 = inlined_call_operand.vmem [shape: f32[2,968], index: 0, kind: input, shape index: {}]   ;;  %s1051_s1 = inlined_call_operand.vmem [shape: f32[968,10], index: 1, kind: input, shape index: {}]   ;;  %s1052_s2 = inlined_call_operand.vmem [shape: f32[1,10], index: 2, kind: input, shape index: {}]   ;;  %s1053_s3 = inlined_call_operand.hbm [shape: f32[2,10], index: 3, kind: output, shape index: {}]  }
   0x1   :  { %v48_v0 = vld [vmem:[%s1051_s1 + $0xf8] sm:$0xff]  ;;  %v47_v4 = vld [vmem:[%s1051_s1 + $0xf0] sm:$0xff]  ;;  %v46_v8 = vld [vmem:[%s1051_s1 + $0xe8] sm:$0xff]  ;;  %v149_v31 = vunpack.c.l.s4 %v621_v30 }
   0x2   :  { %v80_v1 = vld [vmem:[%s1051_s1 + $0x1f8] sm:$0xff]  ;;  %489 = vmatprep.subr.mxu0 %v48_v0  ;;  %v79_v5 = vld [vmem:[%s1051_s1 + $0x1f0] sm:$0xff]  ;;  %v78_v9 = vld [vmem:[%s1051_s1 + $0x1e8] sm:$0xff]  ;;  %v152_v42 = vshrl.u32 %v151_v32, 7 }
   0x3   :  { %v32_v2 = vld [vmem:[%s1051_s1 + $0x78] sm:$0xff]  ;;  %524 = vmatprep.subr.mxu1 %v80_v1  ;;  %v31_v6 = vld [vmem:[%s1051_s1 + $0x70] sm:$0xff]  ;;  %v30_v10 = vld [vmem:[%s1051_s1 + $0x68] sm:$0xff]  ;;  %v150_v41 = vunpack.c.0.s8 %v149_v31 }
   0x4   :  { %v64_v3 = vld [vmem:[%s1051_s1 + $0x178] sm:$0xff]  ;;  %490 = vmatpush3.msra.mxu0 %v32_v2  ;;  %v63_v7 = vld [vmem:[%s1051_s1 + $0x170] sm:$0xff]  ;;  %v62_v11 = vld [vmem:[%s1051_s1 + $0x168] sm:$0xff] }
   0x5   :  { %525 = vmatpush3.msra.mxu1 %v64_v3  ;;  %491 = vmatprep.subr.mxu0 %v47_v4  ;;  %v45_v12 = vld [vmem:[%s1051_s1 + $0xe0] sm:$0xff]  ;;  %v44_v16 = vld [vmem:[%s1051_s1 + $0xd8] sm:$0xff]  ;;  %v43_v20 = vld [vmem:[%s1051_s1 + $0xd0] sm:$0xff]  ;;  %v782_v51 = vsub.s32 %v150_v41, %v152_v42 }
   0x6   :  { %526 = vmatprep.subr.mxu1 %v79_v5  ;;  %492 = vmatpush3.msra.mxu0 %v31_v6  ;;  %v77_v13 = vld [vmem:[%s1051_s1 + $0x1e0] sm:$0xff]  ;;  %v76_v17 = vld [vmem:[%s1051_s1 + $0x1d8] sm:$0xff]  ;;  %v75_v21 = vld [vmem:[%s1051_s1 + $0x1d0] sm:$0xff] }
   0x7   :  { %527 = vmatpush3.msra.mxu1 %v63_v7  ;;  %493 = vmatprep.subr.mxu0 %v46_v8  ;;  %v29_v14 = vld [vmem:[%s1051_s1 + $0x60] sm:$0xff]  ;;  %v28_v18 = vld [vmem:[%s1051_s1 + $0x58] sm:$0xff]  ;;  %v27_v22 = vld [vmem:[%s1051_s1 + $0x50] sm:$0xff] }
   0x8   :  { %528 = vmatprep.subr.mxu1 %v78_v9  ;;  %v61_v15 = vld [vmem:[%s1051_s1 + $0x160] sm:$0xff]  ;;  %494 = vmatpush3.msra.mxu0 %v30_v10  ;;  %v60_v19 = vld [vmem:[%s1051_s1 + $0x158] sm:$0xff]  ;;  %v59_v23 = vld [vmem:[%s1051_s1 + $0x150] sm:$0xff] }
   0x9   :  { %529 = vmatpush3.msra.mxu1 %v62_v11  ;;  %495 = vmatprep.subr.mxu0 %v45_v12  ;;  %v42_v24 = vld [vmem:[%s1051_s1 + $0xc8] sm:$0xff]  ;;  %v41_v28 = vld [vmem:[%s1051_s1 + $0xc0] sm:$0xff]  ;;  %v40_v35 = vld [vmem:[%s1051_s1 + $0xb8] sm:$0xff] }
   0xa   :  { %530 = vmatprep.subr.mxu1 %v77_v13  ;;  %496 = vmatpush3.msra.mxu0 %v29_v14  ;;  %v74_v25 = vld [vmem:[%s1051_s1 + $0x1c8] sm:$0xff]  ;;  %v73_v29 = vld [vmem:[%s1051_s1 + $0x1c0] sm:$0xff]  ;;  %v72_v36 = vld [vmem:[%s1051_s1 + $0x1b8] sm:$0xff] }
   0xb   :  { %531 = vmatpush3.msra.mxu1 %v61_v15  ;;  %497 = vmatprep.subr.mxu0 %v44_v16  ;;  %v26_v26 = vld [vmem:[%s1051_s1 + $0x48] sm:$0xff]  ;;  %v25_v33 = vld [vmem:[%s1051_s1 + $0x40] sm:$0xff]  ;;  %v24_v37 = vld [vmem:[%s1051_s1 + $0x38] sm:$0xff]  ;;  %v622_v16 = vmov 0.0  }
   0xc   :  { %532 = vmatprep.subr.mxu1 %v76_v17  ;;  %498 = vmatpush3.msra.mxu0 %v28_v18  ;;  %v58_v27 = vld [vmem:[%s1051_s1 + $0x148] sm:$0xff]  ;;  %v57_v34 = vld [vmem:[%s1051_s1 + $0x140] sm:$0xff]  ;;  %v56_v38 = vld [vmem:[%s1051_s1 + $0x138] sm:$0xff] }
   0xd   :  { %533 = vmatpush3.msra.mxu1 %v60_v19  ;;  %499 = vmatprep.subr.mxu0 %v43_v20  ;;  %v39_v39 = vld [vmem:[%s1051_s1 + $0xb0] sm:$0xff]  ;;  %v38_v45 = vld [vmem:[%s1051_s1 + $0xa8] sm:$0xff]  ;;  %v37_v49 = vld [vmem:[%s1051_s1 + $0xa0] sm:$0xff] }
   0xe   :  { %534 = vmatprep.subr.mxu1 %v75_v21  ;;  %500 = vmatpush3.msra.mxu0 %v27_v22  ;;  %v71_v40 = vld [vmem:[%s1051_s1 + $0x1b0] sm:$0xff]  ;;  %v70_v46 = vld [vmem:[%s1051_s1 + $0x1a8] sm:$0xff]  ;;  %v69_v50 = vld [vmem:[%s1051_s1 + $0x1a0] sm:$0xff] }
   0xf   :  { %535 = vmatpush3.msra.mxu1 %v59_v23  ;;  %501 = vmatprep.subr.mxu0 %v42_v24  ;;  %v23_v43 = vld [vmem:[%s1051_s1 + $0x30] sm:$0xff]  ;;  %v22_v47 = vld [vmem:[%s1051_s1 + $0x28] sm:$0xff]  ;;  %v21_v52 = vld [vmem:[%s1051_s1 + $0x20] sm:$0xff] }
  0x10   :  { %536 = vmatprep.subr.mxu1 %v74_v25  ;;  %502 = vmatpush3.msra.mxu0 %v26_v26  ;;  %v55_v44 = vld [vmem:[%s1051_s1 + $0x130] sm:$0xff]  ;;  %v54_v48 = vld [vmem:[%s1051_s1 + $0x128] sm:$0xff]  ;;  %v53_v53 = vld [vmem:[%s1051_s1 + $0x120] sm:$0xff] }
  0x11   :  { %537 = vmatpush3.msra.mxu1 %v58_v27  ;;  %503 = vmatprep.subr.mxu0 %v41_v28  ;;  %v15_v54 = vld [vmem:[%s1050_s0] sm:$0xff]  ;;  %v36_v55 = vld [vmem:[%s1051_s1 + $0x98] sm:$0xff]  ;;  %v35_v60 = vld [vmem:[%s1051_s1 + $0x90] sm:$0xff] }
  0x12   :  { %538 = vmatprep.subr.mxu1 %v73_v29  ;;  %504 = vmatpush3.msra.mxu0 %v25_v33  ;;  %v68_v56 = vld [vmem:[%s1051_s1 + $0x198] sm:$0xff]  ;;  %v147_v57 = vcombine.high %v15_v54, %v15_v54  ;;  %v67_v61 = vld [vmem:[%s1051_s1 + $0x190] sm:$0xff]  ;;  %v154_v62 = vrot.slane %v15_v54, %v782_v51  ;;  %v34_v2 = vld [vmem:[%s1051_s1 + $0x88] sm:$0xff] }
  0x13   :  { %539 = vmatpush3.msra.mxu1 %v57_v34  ;;  %505 = vmatprep.subr.mxu0 %v40_v35  ;;  %v20_v58 = vld [vmem:[%s1051_s1 + $0x18] sm:$0xff]  ;;  %v19_v63 = vld [vmem:[%s1051_s1 + $0x10] sm:$0xff]  ;;  %v66_v3 = vld [vmem:[%s1051_s1 + $0x188] sm:$0xff] }
  0x14   :  { %540 = vmatprep.subr.mxu1 %v72_v36  ;;  %506 = vmatpush3.msra.mxu0 %v24_v37  ;;  %v52_v59 = vld [vmem:[%s1051_s1 + $0x118] sm:$0xff]  ;;  %v51_v0 = vld [vmem:[%s1051_s1 + $0x110] sm:$0xff]  ;;  %v161_v1 = vrot.slane %v147_v57, %v782_v51  ;;  %v18_v4 = vld [vmem:[%s1051_s1 + $0x8] sm:$0xff]  ;;  %v162_v8 = vcombine.high %v154_v62, %v154_v62 }
  0x15   :  { %541 = vmatpush3.msra.mxu1 %v56_v38  ;;  %507 = vmatprep.subr.mxu0 %v39_v39  ;;  %v50_v5 = vld [vmem:[%s1051_s1 + $0x108] sm:$0xff]  ;;  %v33_v6 = vld [vmem:[%s1051_s1 + $0x80] sm:$0xff]  ;;  %v112_v12 = vld [vmem:[%s1051_s1 + $0x2f8] sm:$0xff] }
  0x16   :  { %542 = vmatprep.subr.mxu1 %v71_v40  ;;  %508 = vmatpush3.msra.mxu0 %v23_v43  ;;  %v65_v7 = vld [vmem:[%s1051_s1 + $0x180] sm:$0xff]  ;;  %v163_v10 = vcombine.high %v161_v1, %v161_v1  ;;  %v96_v13 = vld [vmem:[%s1051_s1 + $0x278] sm:$0xff]  ;;  %v111_v15 = vld [vmem:[%s1051_s1 + $0x2f0] sm:$0xff] }
  0x17   :  { %543 = vmatpush3.msra.mxu1 %v55_v44  ;;  %509 = vmatprep.subr.mxu0 %v38_v45  ;;  %v17_v9 = vld [vmem:[%s1051_s1] sm:$0xff]  ;;  %v128_v14 = vld [vmem:[%s1051_s1 + $0x378] sm:$0xff]  ;;  %v95_v17 = vld [vmem:[%s1051_s1 + $0x270] sm:$0xff] }
  0x18   :  { %544 = vmatprep.subr.mxu1 %v70_v46  ;;  %510 = vmatpush3.msra.mxu0 %v22_v47  ;;  %v49_v11 = vld [vmem:[%s1051_s1 + $0x100] sm:$0xff]  ;;  %v127_v18 = vld [vmem:[%s1051_s1 + $0x370] sm:$0xff]  ;;  %v110_v19 = vld [vmem:[%s1051_s1 + $0x2e8] sm:$0xff] }
  0x19   :  { %545 = vmatpush3.msra.mxu1 %v54_v48  ;;  %511 = vmatprep.subr.mxu0 %v37_v49  ;;  %v94_v20 = vld [vmem:[%s1051_s1 + $0x268] sm:$0xff]  ;;  %v109_v22 = vld [vmem:[%s1051_s1 + $0x2e0] sm:$0xff]  ;;  %v108_v25 = vld [vmem:[%s1051_s1 + $0x2d8] sm:$0xff] }
  0x1a   :  { %546 = vmatprep.subr.mxu1 %v69_v50  ;;  %512 = vmatpush3.msra.mxu0 %v21_v52  ;;  %v126_v21 = vld [vmem:[%s1051_s1 + $0x368] sm:$0xff]  ;;  %v93_v23 = vld [vmem:[%s1051_s1 + $0x260] sm:$0xff]  ;;  %v92_v26 = vld [vmem:[%s1051_s1 + $0x258] sm:$0xff] }
  0x1b   :  { %547 = vmatpush3.msra.mxu1 %v53_v53  ;;  %513 = vmatprep.subr.mxu0 %v36_v55  ;;  %v125_v24 = vld [vmem:[%s1051_s1 + $0x360] sm:$0xff]  ;;  %v124_v27 = vld [vmem:[%s1051_s1 + $0x358] sm:$0xff] }
  0x1c   :  { %548 = vmatprep.subr.mxu1 %v68_v56  ;;  %514 = vmatpush3.msra.mxu0 %v20_v58 }
  0x1d   :  { %549 = vmatpush3.msra.mxu1 %v52_v59  ;;  %515 = vmatprep.subr.mxu0 %v35_v60 }
  0x1e   :  { %550 = vmatprep.subr.mxu1 %v67_v61  ;;  %516 = vmatpush3.msra.mxu0 %v19_v63 }
  0x1f   :  { %551 = vmatpush3.msra.mxu1 %v51_v0  ;;  %517 = vmatprep.subr.mxu0 %v34_v2 }
  0x20   :  { %552 = vmatprep.subr.mxu1 %v66_v3  ;;  %518 = vmatpush3.msra.mxu0 %v18_v4 }
  0x21   :  { %553 = vmatpush3.msra.mxu1 %v50_v5  ;;  %519 = vmatprep.subr.mxu0 %v33_v6 }
  0x22   :  { %554 = vmatprep.subr.mxu1 %v65_v7  ;;  %520 = vmatpush3.msra.mxu0 %v17_v9 }
  0x23   :  { %255 = vmatprep.mubr.f32.mxu0 %v162_v8  ;;  %555 = vmatpush3.msra.mxu1 %v49_v11 }
  0x24   :  { %325 = vmatprep.mubr.f32.mxu1 %v163_v10  ;;  %256 = vmatmul.mubr.f32.vlgmr.msra.gmra.mxu0 %v154_v62 }
  0x25   :  { %326 = vmatmul.mubr.f32.vlgmr.msra.gmra.mxu1 %v161_v1  ;;  %559 = vmatprep.subr.mxu0 %v112_v12 }
  0x26   :  { %401 = vmatprep.subr.mxu1 %v622_v16  ;;  %560 = vmatpush3.msra.mxu0 %v96_v13 }
  0x27   :  { %402 = vmatpush1.msra.mxu1 %v128_v14  ;;  %561 = vmatprep.subr.mxu0 %v111_v15 }
  0x28   :  { %403 = vmatprep.subr.mxu1 %v622_v16  ;;  %562 = vmatpush3.msra.mxu0 %v95_v17 }
  0x29   :  { %404 = vmatpush1.msra.mxu1 %v127_v18  ;;  %563 = vmatprep.subr.mxu0 %v110_v19 }
  0x2a   :  { %405 = vmatprep.subr.mxu1 %v622_v16  ;;  %564 = vmatpush3.msra.mxu0 %v94_v20 }
  0x2b   :  { %406 = vmatpush1.msra.mxu1 %v126_v21  ;;  %565 = vmatprep.subr.mxu0 %v109_v22 }
  0x2c   :  { %407 = vmatprep.subr.mxu1 %v622_v16 }
  0x2d   :  { %8 = vsyncpa [#allocation3], 0  ;;  %566 = vmatpush3.msra.mxu0 %v93_v23  ;;  %408 = vmatpush1.msra.mxu1 %v125_v24  ;;  %v107_v28 = vld [vmem:[%s1051_s1 + $0x2d0] sm:$0xff]  ;;  %v106_v31 = vld [vmem:[%s1051_s1 + $0x2c8] sm:$0xff]  ;;  %vm188_vm0 = vcmask 588800   ;;  %vm471_vm1 = vcmask 74752  }
  0x2e   :  { %567 = vmatprep.subr.mxu0 %v108_v25  ;;  %409 = vmatprep.subr.mxu1 %v622_v16  ;;  %v91_v29 = vld [vmem:[%s1051_s1 + $0x250] sm:$0xff]  ;;  %v90_v32 = vld [vmem:[%s1051_s1 + $0x248] sm:$0xff]  ;;  %v105_v34 = vld [vmem:[%s1051_s1 + $0x2c0] sm:$0xff] }
  0x2f   :  { %v123_v30 = vld [vmem:[%s1051_s1 + $0x350] sm:$0xff]  ;;  %568 = vmatpush3.msra.mxu0 %v92_v26  ;;  %410 = vmatpush1.msra.mxu1 %v124_v27  ;;  %v122_v33 = vld [vmem:[%s1051_s1 + $0x348] sm:$0xff]  ;;  %v89_v35 = vld [vmem:[%s1051_s1 + $0x240] sm:$0xff] }
  0x30   :  { %569 = vmatprep.subr.mxu0 %v107_v28  ;;  %411 = vmatprep.subr.mxu1 %v622_v16  ;;  %v121_v36 = vld [vmem:[%s1051_s1 + $0x340] sm:$0xff]  ;;  %v104_v37 = vld [vmem:[%s1051_s1 + $0x2b8] sm:$0xff]  ;;  %v103_v40 = vld [vmem:[%s1051_s1 + $0x2b0] sm:$0xff] }
  0x31   :  { %570 = vmatpush3.msra.mxu0 %v91_v29  ;;  %412 = vmatpush1.msra.mxu1 %v123_v30  ;;  %v88_v38 = vld [vmem:[%s1051_s1 + $0x238] sm:$0xff]  ;;  %v87_v41 = vld [vmem:[%s1051_s1 + $0x230] sm:$0xff]  ;;  %v102_v43 = vld [vmem:[%s1051_s1 + $0x2a8] sm:$0xff] }
  0x32   :  { %571 = vmatprep.subr.mxu0 %v106_v31  ;;  %413 = vmatprep.subr.mxu1 %v622_v16  ;;  %v120_v39 = vld [vmem:[%s1051_s1 + $0x338] sm:$0xff]  ;;  %v119_v42 = vld [vmem:[%s1051_s1 + $0x330] sm:$0xff]  ;;  %v86_v44 = vld [vmem:[%s1051_s1 + $0x228] sm:$0xff] }
  0x33   :  { %572 = vmatpush3.msra.mxu0 %v90_v32  ;;  %414 = vmatpush1.msra.mxu1 %v122_v33  ;;  %v118_v45 = vld [vmem:[%s1051_s1 + $0x328] sm:$0xff]  ;;  %v101_v46 = vld [vmem:[%s1051_s1 + $0x2a0] sm:$0xff]  ;;  %v100_v50 = vld [vmem:[%s1051_s1 + $0x298] sm:$0xff] }
  0x34   :  { %573 = vmatprep.subr.mxu0 %v105_v34  ;;  %415 = vmatprep.subr.mxu1 %v622_v16  ;;  %v85_v47 = vld [vmem:[%s1051_s1 + $0x220] sm:$0xff]  ;;  %v16_v49 = vld [vmem:[%s1050_s0 + $0x8] sm:$0xff]  ;;  %v84_v53 = vld [vmem:[%s1051_s1 + $0x218] sm:$0xff] }
  0x35   :  { %574 = vmatpush3.msra.mxu0 %v89_v35  ;;  %416 = vmatpush1.msra.mxu1 %v121_v36  ;;  %v117_v48 = vld [vmem:[%s1051_s1 + $0x320] sm:$0xff]  ;;  %v164_v52 = vcombine.high %v16_v49, %v16_v49  ;;  %v116_v54 = vld [vmem:[%s1051_s1 + $0x318] sm:$0xff]  ;;  %v99_v55 = vld [vmem:[%s1051_s1 + $0x290] sm:$0xff]  ;;  %v171_v56 = vrot.slane %v16_v49, %v782_v51 }
  0x36   :  { %575 = vmatprep.subr.mxu0 %v104_v37  ;;  %417 = vmatprep.subr.mxu1 %v622_v16  ;;  %v83_v57 = vld [vmem:[%s1051_s1 + $0x210] sm:$0xff]  ;;  %v98_v59 = vld [vmem:[%s1051_s1 + $0x288] sm:$0xff]  ;;  %v97_v63 = vld [vmem:[%s1051_s1 + $0x280] sm:$0xff] }
  0x37   :  { %576 = vmatpush3.msra.mxu0 %v88_v38  ;;  %418 = vmatpush1.msra.mxu1 %v120_v39  ;;  %v115_v58 = vld [vmem:[%s1051_s1 + $0x310] sm:$0xff]  ;;  %v178_v60 = vrot.slane %v164_v52, %v782_v51  ;;  %v82_v61 = vld [vmem:[%s1051_s1 + $0x208] sm:$0xff]  ;;  %v179_v0 = vcombine.high %v171_v56, %v171_v56  ;;  %v81_v51 = vld [vmem:[%s1051_s1 + $0x200] sm:$0xff] }
  0x38   :  { %577 = vmatprep.subr.mxu0 %v103_v40  ;;  %419 = vmatprep.subr.mxu1 %v622_v16  ;;  %v114_v62 = vld [vmem:[%s1051_s1 + $0x308] sm:$0xff]  ;;  %v113_v1 = vld [vmem:[%s1051_s1 + $0x300] sm:$0xff]  ;;  %v136_v4 = vld [vmem:[%s1051_s1 + $0x3b8] sm:$0xff] }
  0x39   :  { %578 = vmatpush3.msra.mxu0 %v87_v41  ;;  %420 = vmatpush1.msra.mxu1 %v119_v42  ;;  %v180_v2 = vcombine.high %v178_v60, %v178_v60  ;;  %v137_v3 = vld [vmem:[%s1051_s1 + $0x3c0] sm:$0xff]  ;;  %v135_v5 = vld [vmem:[%s1051_s1 + $0x3b0] sm:$0xff]  ;;  %v134_v6 = vld [vmem:[%s1051_s1 + $0x3a8] sm:$0xff] }
  0x3a   :  { %579 = vmatprep.subr.mxu0 %v102_v43  ;;  %421 = vmatprep.subr.mxu1 %v622_v16  ;;  %v133_v7 = vld [vmem:[%s1051_s1 + $0x3a0] sm:$0xff]  ;;  %v132_v8 = vld [vmem:[%s1051_s1 + $0x398] sm:$0xff]  ;;  %v131_v9 = vld [vmem:[%s1051_s1 + $0x390] sm:$0xff] }
  0x3b   :  { %580 = vmatpush3.msra.mxu0 %v86_v44  ;;  %422 = vmatpush1.msra.mxu1 %v118_v45  ;;  %v130_v10 = vld [vmem:[%s1051_s1 + $0x388] sm:$0xff]  ;;  %v129_v11 = vld [vmem:[%s1051_s1 + $0x380] sm:$0xff]  ;;  %s623_s1 = smov [#allocation2]  }
  0x3c   :  { %581 = vmatprep.subr.mxu0 %v101_v46  ;;  %423 = vmatprep.subr.mxu1 %v622_v16  ;;  %v487_v18 = vld [vmem:[%s1052_s2] ss:$0 sm:$0xff]  ;;  %s479_s15 = sshll.u32 %s623_s1, 4  ;;  %s480_s15 = int_to_ptr.vmem [resolvable:$true] %s479_s15 }
  0x3d   :  { %582 = vmatpush3.msra.mxu0 %v85_v47  ;;  %424 = vmatpush1.msra.mxu1 %v117_v48  ;;  %s599_s16 = scalar_lea.vmem %s480_s15, 32  ;;  %p604_p1 = scmp.lt.s32.totalorder %s480_s15, %s480_s15 }
  0x3e   :  { %583 = vmatprep.subr.mxu0 %v100_v50  ;;  %425 = vmatprep.subr.mxu1 %v622_v16  ;;  %p600_p0 = scmp.ne.s32.totalorder %s480_s15, %s599_s16  ;;  %p605_p2 = scmp.lt.s32.totalorder %s599_s16, %s599_s16 }
  0x3f   :  { %584 = vmatpush3.msra.mxu0 %v84_v53  ;;  %426 = vmatpush1.msra.mxu1 %v116_v54 }
  0x40   :  { %585 = vmatprep.subr.mxu0 %v99_v55  ;;  %427 = vmatprep.subr.mxu1 %v622_v16  ;;  %p606_p3 = por %p605_p2, %p604_p1 }
  0x41   :  { %586 = vmatpush3.msra.mxu0 %v83_v57  ;;  %428 = vmatpush1.msra.mxu1 %v115_v58 }
  0x42   :  { %587 = vmatprep.subr.mxu0 %v98_v59  ;;  %429 = vmatprep.subr.mxu1 %v622_v16  ;;  %p607_p4 = pnand %p606_p3, %p600_p0 }
  0x43   :  { %588 = vmatpush3.msra.mxu0 %v82_v61  ;;  %430 = vmatpush1.msra.mxu1 %v114_v62 }
  0x44   :  { %589 = vmatprep.subr.mxu0 %v97_v63  ;;  %431 = vmatprep.subr.mxu1 %v622_v16 }
  0x45   :  { %590 = vmatpush3.msra.mxu0 %v81_v51  ;;  %395 = vmatprep.mubr.f32.mxu0 %v179_v0 }
  0x46   :  { %432 = vmatpush1.msra.mxu1 %v113_v1  ;;  %396 = vmatmul.mubr.f32.vlgmr.msra.gmra.mxu0 %v171_v56 }
  0x47   :  { %447 = vmatprep.subr.mxu1 %v622_v16  ;;  %488 = vmatprep.mubr.msk.f32.mxu1 %vm188_vm0, %v180_v2 }
  0x48   :  { %448 = vmatpush2.msra.mxu1 %v137_v3 }
  0x49   :  { %449 = vmatprep.subr.mxu1 %v622_v16 }
  0x4a   :  { %450 = vmatpush2.msra.mxu1 %v136_v4 }
  0x4b   :  { %451 = vmatprep.subr.mxu1 %v622_v16 }
  0x4c   :  { %452 = vmatpush2.msra.mxu1 %v135_v5 }
  0x4d   :  { %453 = vmatprep.subr.mxu1 %v622_v16 }
  0x4e   :  { %454 = vmatpush2.msra.mxu1 %v134_v6 }
  0x4f   :  { %455 = vmatprep.subr.mxu1 %v622_v16 }
  0x50   :  { %456 = vmatpush2.msra.mxu1 %v133_v7 }
  0x51   :  { %457 = vmatprep.subr.mxu1 %v622_v16 }
  0x52   :  { %458 = vmatpush2.msra.mxu1 %v132_v8 }
  0x53   :  { %459 = vmatprep.subr.mxu1 %v622_v16 }
  0x54   :  { %460 = vmatpush2.msra.mxu1 %v131_v9 }
  0x55   :  { %461 = vmatprep.subr.mxu1 %v622_v16 }
  0x56   :  { %462 = vmatpush2.msra.mxu1 %v130_v10 }
  0x57   :  { %463 = vmatprep.subr.mxu1 %v622_v16 }
  0x58   :  { %464 = vmatpush2.msra.mxu1 %v129_v11 }
  0x59   :  { %466 = vmatmul.mubr.f32.vlgmr.msra.gmra.mxu1 %v178_v60 }
  0xe4   :  { %v521_v12 = vpop.f32.mrf.mxu0 }
  0xe5   :  { %v556_v14 = vpop.f32.mrf.mxu1 }
  0xe6   :  { %v522_v13 = vpop.f32.mrf.mxu0 }
  0xe7   :  { %v523_v17 = vadd.f32 %v522_v13, %v521_v12  ;;  %v557_v19 = vpop.f32.mrf.mxu1 }
  0xe8   :  { %v558_v22 = vadd.f32 %v557_v19, %v556_v14 }
  0xe9   :  { %v258_v21 = vadd.f32 %v523_v17, %v487_v18 }
  0xeb   :  { %v328_v24 = vadd.f32 %v558_v22, %v258_v21 }
 0x106   :  { %v591_v15 = vpop.f32.mrf.mxu0 }
 0x108   :  { %v592_v20 = vpop.f32.mrf.mxu0 }
 0x109   :  { %v593_v23 = vadd.f32 %v592_v20, %v591_v15 }
 0x10b   :  { %v398_v16 = vadd.f32 %v593_v23, %v328_v24 }
 0x119   :  { %v467_v25 = vpop.f32.mrf.mxu1 }
 0x11a   :  { %v468_v26 = vadd.f32 %v467_v25, %v398_v16 }
 0x11b   :  { %v469_v27 = vpop.f32.mrf.mxu1 }
 0x11c   :  { %472 = vst.msk [vmem:[#allocation2] sm:$0x3] %vm471_vm1, %v468_v26 }
 0x11d   :  { %610 = shalt.err (!%p607_p4)
}
 0x11e   :  { %482 = dma.vmem_to_hbm [thread:$0]  %s480_s15, 32, %s1053_s3, [#allocation3]  }
 0x11f   :  { %619 = dma.done.wait [#allocation3], 32  }
 0x120   :  { %620 = vsyncadd [#allocation3], 4294967264 }
 0x121   :  { %486 = vsyncpa [#allocation3], 1 }

</bundles_post_ra>
